<compile_context>
chip_gen: v7x
topology: tpu7x:2x2x1
jax: 0.10.0
libtpu: 0.0.40
codegen_flags: <defaults>
</compile_context>

<pallas_src>
import functools

import jax
import jax.numpy as jnp
from jax.experimental import pallas as pl
from jax.experimental.pallas import tpu as pltpu

_VMEM = pl.BlockSpec(memory_space=pltpu.MemorySpace.VMEM)
_EMB_HIDDEN = 1024  # EmbeddingDNN.fc1 output width (fixed in the reference module)


def _round_up(x, m):
    return ((x + m - 1) // m) * m


# -----------------------------------------------------------------------------
# Fused forward kernel: every matmul / bias / relu stays in VMEM.
# -----------------------------------------------------------------------------
def _fused_kernel(
    smiles_ref, node_x_ref, a_norm_ref, pool_ref,       # activations (f32)
    e1w_ref, e2w_ref, gfw_ref, wslab_ref, bias_ref,      # packed params
    out_ref,
    *, hidden_dim, cp,
):
    f32, bf16 = jnp.float32, jnp.bfloat16
    H = hidden_dim

    def mm(x, w):
        # MXU: bf16 x bf16 inputs, f32 accumulate.  Elementwise math stays f32.
        return jnp.dot(x.astype(bf16), w.astype(bf16), preferred_element_type=f32)

    # ---- packed-slab static slices (all at 128-lane boundaries for H=64) ----
    g2w = wslab_ref[:, 0:2 * H]                                  # (H, 2H)  conv2
    wg = wslab_ref[:, 2 * H:2 * H + cp]                          # (H, Cp)  folded gcn-branch tail
    we = wslab_ref[:, 2 * H + cp:2 * H + 2 * cp]                 # (H, Cp)  folded emb-branch tail
    g1w = wslab_ref[:, 2 * H + 2 * cp:2 * H + 2 * cp + H]        # (H, H)   conv1

    e1b = bias_ref[0:1, 0:_EMB_HIDDEN]
    e2b = bias_ref[1:2, 0:H]
    g1b = bias_ref[2:3, 0:H]
    g2b = bias_ref[3:4, 0:2 * H]
    gfb = bias_ref[4:5, 0:H]
    btl = bias_ref[5:6, 0:cp]

    # ---- EmbeddingDNN: relu(fc1) -> dropout(id) -> fc2 ----
    h = jnp.maximum(mm(smiles_ref[...], e1w_ref[...]) + e1b, 0.0)      # (Bp, 1024)
    emb = mm(h, e2w_ref[...]) + e2b                                    # (Bp, H)

    # ---- GCN: conv1 -> relu -> conv2 -> mean_pool -> dropout(id) -> fc ----
    a = a_norm_ref[...].astype(bf16)                                   # (Np, Np)
    c1 = jnp.dot(a, mm(node_x_ref[...], g1w).astype(bf16),
                 preferred_element_type=f32) + g1b                     # (Np, H)
    c1 = jnp.maximum(c1, 0.0)
    c2 = jnp.dot(a, mm(c1, g2w).astype(bf16),
                 preferred_element_type=f32) + g2b                     # (Np, 2H)
    pooled = mm(pool_ref[...], c2)                                     # (Bp, 2H)
    gcn = mm(pooled, gfw_ref[...]) + gfb                               # (Bp, H)

    # ---- cross attention + fusion head ----
    # Sequence length is 1, so softmax over the single key is exactly 1.0 and each
    # AttentionLayer2 output equals its fc_value projection (q/k/softmax are dead).
    # The linear tail V-proj -> cat -> fc1 -> dropout(id) -> fc_final was folded on
    # the host into wg / we / btl.
    out = mm(gcn, wg) + mm(emb, we) + btl                              # (Bp, Cp) lane-dense
    out_ref[...] = out.astype(out_ref.dtype)


# -----------------------------------------------------------------------------
# Graph glue (plain JAX): dense normalized adjacency + mean-pool matrix
# -----------------------------------------------------------------------------
def gcn_norm_dense(edge_index, num_nodes):
    """D^{-1/2} (A + I) D^{-1/2} with A[dst, src] = 1 (PyG source->target flow)."""
    src, dst = edge_index[0], edge_index[1]
    A = jnp.zeros((num_nodes, num_nodes), jnp.float32).at[dst, src].add(1.0)
    A = A + jnp.eye(num_nodes, dtype=jnp.float32)
    deg = A.sum(axis=1)
    dinv = jnp.where(deg > 0, 1.0 / jnp.sqrt(deg), 0.0)
    return dinv[:, None] * A * dinv[None, :]


def mean_pool_matrix(batch, num_graphs, num_nodes):
    onehot = (batch[None, :] == jnp.arange(num_graphs)[:, None]).astype(jnp.float32)
    counts = onehot.sum(axis=1, keepdims=True)
    return onehot / jnp.maximum(counts, 1.0)


# -----------------------------------------------------------------------------
# Parameters (deterministic synthetic init matching the PyTorch module shapes)
# -----------------------------------------------------------------------------
def init_params(key, embedding_dim, hidden_dim=64, num_classes=1):
    gcn_in = 64  # GCN(input_dim=64, ...) hard-coded in CombinedCrossAttBiClassModel
    shapes = {
        # EmbeddingDNN
        "emb_fc1_w": (embedding_dim, _EMB_HIDDEN), "emb_fc1_b": (_EMB_HIDDEN,),
        "emb_fc2_w": (_EMB_HIDDEN, hidden_dim), "emb_fc2_b": (hidden_dim,),
        # GCN
        "gcn_conv1_w": (gcn_in, gcn_in), "gcn_conv1_b": (gcn_in,),
        "gcn_conv2_w": (gcn_in, gcn_in * 2), "gcn_conv2_b": (gcn_in * 2,),
        "gcn_fc_w": (gcn_in * 2, hidden_dim), "gcn_fc_b": (hidden_dim,),
        # AttentionLayer2 #1 (query=emb, key=value=gcn).  q/k weights exist in the
        # module but are mathematically dead in the forward (seq-len-1 softmax == 1).
        "att1_q_w": (hidden_dim, hidden_dim), "att1_q_b": (hidden_dim,),
        "att1_k_w": (hidden_dim, hidden_dim), "att1_k_b": (hidden_dim,),
        "att1_v_w": (hidden_dim, hidden_dim), "att1_v_b": (hidden_dim,),
        # AttentionLayer2 #2 (query=gcn, key=value=emb)
        "att2_q_w": (hidden_dim, hidden_dim), "att2_q_b": (hidden_dim,),
        "att2_k_w": (hidden_dim, hidden_dim), "att2_k_b": (hidden_dim,),
        "att2_v_w": (hidden_dim, hidden_dim), "att2_v_b": (hidden_dim,),
        # fusion head
        "fc1_w": (hidden_dim * 2, hidden_dim), "fc1_b": (hidden_dim,),
        "fc_final_w": (hidden_dim, num_classes), "fc_final_b": (num_classes,),
    }
    params = {}
    keys = jax.random.split(key, len(shapes))
    for k_rng, (name, shape) in zip(keys, sorted(shapes.items())):
        fan_in = shape[0]
        scale = 1.0 / jnp.sqrt(jnp.float32(fan_in))
        params[name] = scale * jax.random.normal(k_rng, shape, dtype=jnp.float32)
    return params


# -----------------------------------------------------------------------------
# One-time parameter packing (folding, padding, bf16 cast) — outside per-call path
# -----------------------------------------------------------------------------
def pack_params(params, hidden_dim=64, num_classes=1):
    H = hidden_dim
    Cp = _round_up(max(num_classes, 1), 128)
    f32, bf16 = jnp.float32, jnp.bfloat16

    # Fold the linear tail.  attended_smiles = gcn @ a1vw + a1vb (softmax == 1),
    # attended_graph = emb @ a2vw + a2vb.  Then cat -> fc1 -> dropout(id) -> fc_final:
    #   out = gcn @ (a1vw @ f1w[:H] @ ffw) + emb @ (a2vw @ f1w[H:] @ ffw)
    #         + (a1vb @ f1w[:H] + a2vb @ f1w[H:] + f1b) @ ffw + ffb
    f1_top = params["fc1_w"][:H, :]
    f1_bot = params["fc1_w"][H:, :]
    ffw = params["fc_final_w"]
    wg = params["att1_v_w"] @ f1_top @ ffw                     # (H, C) gcn-branch tail
    we = params["att2_v_w"] @ f1_bot @ ffw                     # (H, C) emb-branch tail
    b_tail = ((params["att1_v_b"] @ f1_top
               + params["att2_v_b"] @ f1_bot
               + params["fc1_b"]) @ ffw + params["fc_final_b"])  # (C,)

    wg = jnp.pad(wg, ((0, 0), (0, Cp - wg.shape[1])))
    we = jnp.pad(we, ((0, 0), (0, Cp - we.shape[1])))

    # Weight slab: [conv2 | wg | we | conv1], all with H rows, bf16.
    wslab = jnp.concatenate(
        [params["gcn_conv2_w"], wg, we, params["gcn_conv1_w"]], axis=1).astype(bf16)

    # Bias slab: one left-aligned row per bias, f32, padded to 8 sublanes.
    bw = max(_EMB_HIDDEN, 2 * H, Cp)

    def row(b):
        return jnp.pad(b.astype(f32), (0, bw - b.shape[0]))[None, :]

    bias_slab = jnp.concatenate([
        row(params["emb_fc1_b"]), row(params["emb_fc2_b"]),
        row(params["gcn_conv1_b"]), row(params["gcn_conv2_b"]),
        row(params["gcn_fc_b"]), row(b_tail),
        jnp.zeros((2, bw), f32),
    ], axis=0)

    return {
        "e1w": params["emb_fc1_w"].astype(bf16),
        "e2w": params["emb_fc2_w"].astype(bf16),
        "gfw": params["gcn_fc_w"].astype(bf16),
        "wslab": wslab,
        "bias": bias_slab,
    }


# -----------------------------------------------------------------------------
# Forward pass (mirrors CombinedCrossAttBiClassModel.forward, eval mode)
# -----------------------------------------------------------------------------
def combined_forward(packed, smiles_embedding, node_x, a_norm, pool_mat,
                     hidden_dim=64, num_classes=1):
    B = smiles_embedding.shape[0]
    E = smiles_embedding.shape[-1]
    N = node_x.shape[0]

    # Rows (sublanes) padded to x8; final output lanes padded to x128 (lane-dense store).
    Bp = _round_up(max(B, 1), 8)
    Np = _round_up(max(N, 1), 8)
    Cp = _round_up(max(num_classes, 1), 128)

    smiles = jnp.pad(smiles_embedding.reshape(B, E).astype(jnp.float32),
                     ((0, Bp - B), (0, 0)))
    node_xp = jnp.pad(node_x.astype(jnp.float32), ((0, Np - N), (0, 0)))
    a_normp = jnp.pad(a_norm.astype(jnp.float32), ((0, Np - N), (0, Np - N)))
    poolp = jnp.pad(pool_mat.astype(jnp.float32), ((0, Bp - B), (0, Np - N)))

    # TODO(synk): for large graphs (N*N*4 bytes approaching VMEM) tile a_norm over
    # node blocks with a BlockSpec grid (reduction axis last, pl.when accumulator)
    # instead of keeping the dense adjacency fully VMEM-resident.
    # TODO(synk): once the serving batch yields >=2 row tiles, add a grid over
    # batch-row tiles with dimension_semantics=("parallel",) so v7x's second
    # TensorCore participates.
    args = (smiles, node_xp, a_normp, poolp,
            packed["e1w"], packed["e2w"], packed["gfw"],
            packed["wslab"], packed["bias"])

    out = pl.pallas_call(
        functools.partial(_fused_kernel, hidden_dim=hidden_dim, cp=Cp),
        out_shape=jax.ShapeDtypeStruct((Bp, Cp), jnp.float32),
        in_specs=[_VMEM] * len(args),
        out_specs=_VMEM,
    )(*args)
    return out[:B, :num_classes]


if __name__ == "__main__":
    key = jax.random.PRNGKey(0)
    k_par, k_emb, k_nodes = jax.random.split(key, 3)

    embedding_dim = 32
    hidden_dim = 64
    num_classes = 1
    B = 2            # number of graphs / batch size
    N = 8            # total nodes across the batch
    gcn_in = 64      # node feature dim (GCN input_dim=64)

    params = init_params(k_par, embedding_dim, hidden_dim, num_classes)
    packed = pack_params(params, hidden_dim=hidden_dim, num_classes=num_classes)

    # smiles_embedding: (B, 1, embedding_dim) as in the PyTorch module
    smiles_embedding = jax.random.normal(k_emb, (B, 1, embedding_dim), dtype=jnp.float32)

    # Graph data: nodes 0..3 -> graph 0, nodes 4..7 -> graph 1, undirected ring edges
    node_x = jax.random.normal(k_nodes, (N, gcn_in), dtype=jnp.float32)
    edges = [(0, 1), (1, 2), (2, 3), (3, 0), (4, 5), (5, 6), (6, 7), (7, 4)]
    src = [s for s, d in edges] + [d for s, d in edges]
    dst = [d for s, d in edges] + [s for s, d in edges]
    edge_index = jnp.array([src, dst], dtype=jnp.int32)
    batch = jnp.array([0, 0, 0, 0, 1, 1, 1, 1], dtype=jnp.int32)

    a_norm = gcn_norm_dense(edge_index, N)
    pool_mat = mean_pool_matrix(batch, B, N)

    fwd = jax.jit(combined_forward)
    out = fwd(packed, smiles_embedding, node_x, a_norm, pool_mat)
    out = jax.block_until_ready(out)
    assert out.shape == (B, num_classes), out.shape
    print("KERNEL_OK")
</pallas_src>

<mosaic_0001>
module attributes {stable_mosaic.version = 11 : i64} {
  func.func @_fused_kernel(%arg0: memref<8x32xf32, #tpu.memory_space<vmem>>, %arg1: memref<8x64xf32, #tpu.memory_space<vmem>>, %arg2: memref<8x8xf32, #tpu.memory_space<vmem>>, %arg3: memref<8x8xf32, #tpu.memory_space<vmem>>, %arg4: memref<32x1024xbf16, #tpu.memory_space<vmem>>, %arg5: memref<1024x64xbf16, #tpu.memory_space<vmem>>, %arg6: memref<128x64xbf16, #tpu.memory_space<vmem>>, %arg7: memref<64x448xbf16, #tpu.memory_space<vmem>>, %arg8: memref<8x1024xf32, #tpu.memory_space<vmem>>, %arg9: memref<8x128xf32, #tpu.memory_space<vmem>>) attributes {dimension_semantics = [], scalar_prefetch = 0 : i64, scratch_operands = 0 : i64, tpu.core_type = #tpu.core_type<tc>} {
    %c0 = arith.constant 0 : index
    %c0_0 = arith.constant 0 : index
    %0 = vector.load %arg7[%c0, %c0_0] : memref<64x448xbf16, #tpu.memory_space<vmem>>, vector<64x128xbf16>
    %c0_1 = arith.constant 0 : index
    %c128 = arith.constant 128 : index
    %1 = vector.load %arg7[%c0_1, %c128] : memref<64x448xbf16, #tpu.memory_space<vmem>>, vector<64x128xbf16>
    %c0_2 = arith.constant 0 : index
    %c256 = arith.constant 256 : index
    %2 = vector.load %arg7[%c0_2, %c256] : memref<64x448xbf16, #tpu.memory_space<vmem>>, vector<64x128xbf16>
    %c0_3 = arith.constant 0 : index
    %c384 = arith.constant 384 : index
    %3 = vector.load %arg7[%c0_3, %c384] : memref<64x448xbf16, #tpu.memory_space<vmem>>, vector<64x64xbf16>
    %c0_4 = arith.constant 0 : index
    %c0_5 = arith.constant 0 : index
    %4 = vector.load %arg8[%c0_4, %c0_5] : memref<8x1024xf32, #tpu.memory_space<vmem>>, vector<1x1024xf32>
    %c1 = arith.constant 1 : index
    %c0_6 = arith.constant 0 : index
    %5 = vector.load %arg8[%c1, %c0_6] : memref<8x1024xf32, #tpu.memory_space<vmem>>, vector<1x64xf32>
    %c2 = arith.constant 2 : index
    %c0_7 = arith.constant 0 : index
    %6 = vector.load %arg8[%c2, %c0_7] : memref<8x1024xf32, #tpu.memory_space<vmem>>, vector<1x64xf32>
    %c3 = arith.constant 3 : index
    %c0_8 = arith.constant 0 : index
    %7 = vector.load %arg8[%c3, %c0_8] : memref<8x1024xf32, #tpu.memory_space<vmem>>, vector<1x128xf32>
    %c4 = arith.constant 4 : index
    %c0_9 = arith.constant 0 : index
    %8 = vector.load %arg8[%c4, %c0_9] : memref<8x1024xf32, #tpu.memory_space<vmem>>, vector<1x64xf32>
    %c5 = arith.constant 5 : index
    %c0_10 = arith.constant 0 : index
    %9 = vector.load %arg8[%c5, %c0_10] : memref<8x1024xf32, #tpu.memory_space<vmem>>, vector<1x128xf32>
    %c0_11 = arith.constant 0 : index
    %c0_12 = arith.constant 0 : index
    %10 = vector.load %arg0[%c0_11, %c0_12] : memref<8x32xf32, #tpu.memory_space<vmem>>, vector<8x32xf32>
    %c0_13 = arith.constant 0 : index
    %c0_14 = arith.constant 0 : index
    %11 = vector.load %arg4[%c0_13, %c0_14] : memref<32x1024xbf16, #tpu.memory_space<vmem>>, vector<32x1024xbf16>
    %12 = arith.truncf %10 : vector<8x32xf32> to vector<8x32xbf16>
    %cst = arith.constant dense<0.000000e+00> : vector<8x1024xf32>
    %13 = tpu.matmul %12, %11, %cst {dimension_numbers = #tpu.dot_dimension_numbers<[1], [0], [0], [1], [0, 0, 1, 1], [], []>} : vector<8x32xbf16>, vector<32x1024xbf16>, vector<8x1024xf32> -> vector<8x1024xf32>
    %14 = vector.broadcast %4 : vector<1x1024xf32> to vector<8x1024xf32>
    %15 = arith.addf %13, %14 : vector<8x1024xf32>
    %cst_15 = arith.constant 0.000000e+00 : f32
    %16 = vector.broadcast %cst_15 : f32 to vector<8x1024xf32>
    %17 = arith.maximumf %15, %16 : vector<8x1024xf32>
    %c0_16 = arith.constant 0 : index
    %c0_17 = arith.constant 0 : index
    %18 = vector.load %arg5[%c0_16, %c0_17] : memref<1024x64xbf16, #tpu.memory_space<vmem>>, vector<1024x64xbf16>
    %19 = arith.truncf %17 : vector<8x1024xf32> to vector<8x1024xbf16>
    %cst_18 = arith.constant dense<0.000000e+00> : vector<8x64xf32>
    %20 = tpu.matmul %19, %18, %cst_18 {dimension_numbers = #tpu.dot_dimension_numbers<[1], [0], [0], [1], [0, 0, 1, 1], [], []>} : vector<8x1024xbf16>, vector<1024x64xbf16>, vector<8x64xf32> -> vector<8x64xf32>
    %21 = vector.broadcast %5 : vector<1x64xf32> to vector<8x64xf32>
    %22 = arith.addf %20, %21 : vector<8x64xf32>
    %c0_19 = arith.constant 0 : index
    %c0_20 = arith.constant 0 : index
    %23 = vector.load %arg2[%c0_19, %c0_20] : memref<8x8xf32, #tpu.memory_space<vmem>>, vector<8x8xf32>
    %24 = arith.truncf %23 : vector<8x8xf32> to vector<8x8xbf16>
    %c0_21 = arith.constant 0 : index
    %c0_22 = arith.constant 0 : index
    %25 = vector.load %arg1[%c0_21, %c0_22] : memref<8x64xf32, #tpu.memory_space<vmem>>, vector<8x64xf32>
    %26 = arith.truncf %25 : vector<8x64xf32> to vector<8x64xbf16>
    %cst_23 = arith.constant dense<0.000000e+00> : vector<8x64xf32>
    %27 = tpu.matmul %26, %3, %cst_23 {dimension_numbers = #tpu.dot_dimension_numbers<[1], [0], [0], [1], [0, 0, 1, 1], [], []>} : vector<8x64xbf16>, vector<64x64xbf16>, vector<8x64xf32> -> vector<8x64xf32>
    %28 = arith.truncf %27 : vector<8x64xf32> to vector<8x64xbf16>
    %cst_24 = arith.constant dense<0.000000e+00> : vector<8x64xf32>
    %29 = tpu.matmul %24, %28, %cst_24 {dimension_numbers = #tpu.dot_dimension_numbers<[1], [0], [0], [1], [0, 0, 1, 1], [], []>} : vector<8x8xbf16>, vector<8x64xbf16>, vector<8x64xf32> -> vector<8x64xf32>
    %30 = vector.broadcast %6 : vector<1x64xf32> to vector<8x64xf32>
    %31 = arith.addf %29, %30 : vector<8x64xf32>
    %cst_25 = arith.constant 0.000000e+00 : f32
    %32 = vector.broadcast %cst_25 : f32 to vector<8x64xf32>
    %33 = arith.maximumf %31, %32 : vector<8x64xf32>
    %34 = arith.truncf %33 : vector<8x64xf32> to vector<8x64xbf16>
    %cst_26 = arith.constant dense<0.000000e+00> : vector<8x128xf32>
    %35 = tpu.matmul %34, %0, %cst_26 {dimension_numbers = #tpu.dot_dimension_numbers<[1], [0], [0], [1], [0, 0, 1, 1], [], []>} : vector<8x64xbf16>, vector<64x128xbf16>, vector<8x128xf32> -> vector<8x128xf32>
    %36 = arith.truncf %35 : vector<8x128xf32> to vector<8x128xbf16>
    %cst_27 = arith.constant dense<0.000000e+00> : vector<8x128xf32>
    %37 = tpu.matmul %24, %36, %cst_27 {dimension_numbers = #tpu.dot_dimension_numbers<[1], [0], [0], [1], [0, 0, 1, 1], [], []>} : vector<8x8xbf16>, vector<8x128xbf16>, vector<8x128xf32> -> vector<8x128xf32>
    %38 = vector.broadcast %7 : vector<1x128xf32> to vector<8x128xf32>
    %39 = arith.addf %37, %38 : vector<8x128xf32>
    %c0_28 = arith.constant 0 : index
    %c0_29 = arith.constant 0 : index
    %40 = vector.load %arg3[%c0_28, %c0_29] : memref<8x8xf32, #tpu.memory_space<vmem>>, vector<8x8xf32>
    %41 = arith.truncf %40 : vector<8x8xf32> to vector<8x8xbf16>
    %42 = arith.truncf %39 : vector<8x128xf32> to vector<8x128xbf16>
    %cst_30 = arith.constant dense<0.000000e+00> : vector<8x128xf32>
    %43 = tpu.matmul %41, %42, %cst_30 {dimension_numbers = #tpu.dot_dimension_numbers<[1], [0], [0], [1], [0, 0, 1, 1], [], []>} : vector<8x8xbf16>, vector<8x128xbf16>, vector<8x128xf32> -> vector<8x128xf32>
    %c0_31 = arith.constant 0 : index
    %c0_32 = arith.constant 0 : index
    %44 = vector.load %arg6[%c0_31, %c0_32] : memref<128x64xbf16, #tpu.memory_space<vmem>>, vector<128x64xbf16>
    %45 = arith.truncf %43 : vector<8x128xf32> to vector<8x128xbf16>
    %cst_33 = arith.constant dense<0.000000e+00> : vector<8x64xf32>
    %46 = tpu.matmul %45, %44, %cst_33 {dimension_numbers = #tpu.dot_dimension_numbers<[1], [0], [0], [1], [0, 0, 1, 1], [], []>} : vector<8x128xbf16>, vector<128x64xbf16>, vector<8x64xf32> -> vector<8x64xf32>
    %47 = vector.broadcast %8 : vector<1x64xf32> to vector<8x64xf32>
    %48 = arith.addf %46, %47 : vector<8x64xf32>
    %49 = arith.truncf %48 : vector<8x64xf32> to vector<8x64xbf16>
    %cst_34 = arith.constant dense<0.000000e+00> : vector<8x128xf32>
    %50 = tpu.matmul %49, %1, %cst_34 {dimension_numbers = #tpu.dot_dimension_numbers<[1], [0], [0], [1], [0, 0, 1, 1], [], []>} : vector<8x64xbf16>, vector<64x128xbf16>, vector<8x128xf32> -> vector<8x128xf32>
    %51 = arith.truncf %22 : vector<8x64xf32> to vector<8x64xbf16>
    %cst_35 = arith.constant dense<0.000000e+00> : vector<8x128xf32>
    %52 = tpu.matmul %51, %2, %cst_35 {dimension_numbers = #tpu.dot_dimension_numbers<[1], [0], [0], [1], [0, 0, 1, 1], [], []>} : vector<8x64xbf16>, vector<64x128xbf16>, vector<8x128xf32> -> vector<8x128xf32>
    %53 = arith.addf %50, %52 : vector<8x128xf32>
    %54 = vector.broadcast %9 : vector<1x128xf32> to vector<8x128xf32>
    %55 = arith.addf %53, %54 : vector<8x128xf32>
    %c0_36 = arith.constant 0 : index
    %c0_37 = arith.constant 0 : index
    %56 = vector.load %arg9[%c0_36, %c0_37] : memref<8x128xf32, #tpu.memory_space<vmem>>, vector<8x128xf32>
    tpu.vector_store %arg9[%c0_36, %c0_37], %55 {strides = array<i32>} : memref<8x128xf32, #tpu.memory_space<vmem>>, vector<8x128xf32>,
    return
  }
}

</mosaic_0001>

<bundles_post_ra>
// kernel: combined_forward.1
= control target key start
LH: loop header
LB: loop body
LE: loop exit
PB: predicated region body
PF: predicated region fallthrough
CT: control target
= control target key end

     0   :  { %v2013_v3 = vmov 0   ;;  %vm212_vm0 = vcmask 261120   ;;  %vm2015_vm1 = vmmov 0   ;;  %vm1096_vm2 = vcmask 523264   ;;  %s2498_s4 = inlined_call_operand.vmem [shape: bf16[32,1024], index: 4, kind: input, shape index: {}]   ;;  %s2499_s0 = inlined_call_operand.vmem [shape: f32[8,32], index: 0, kind: input, shape index: {}]   ;;  %s2500_s5 = inlined_call_operand.vmem [shape: bf16[1024,64], index: 5, kind: input, shape index: {}]   ;;  %s2501_s7 = inlined_call_operand.vmem [shape: bf16[64,448], index: 7, kind: input, shape index: {}]   ;;  %s2502_s8 = inlined_call_operand.vmem [shape: f32[8,1024], index: 8, kind: input, shape index: {}]   ;;  %s2503_s1 = inlined_call_operand.vmem [shape: f32[8,64], index: 1, kind: input, shape index: {}]   ;;  %s2504_s2 = inlined_call_operand.vmem [shape: f32[8,8], index: 2, kind: input, shape index: {}]   ;;  %s2505_s6 = inlined_call_operand.vmem [shape: bf16[128,64], index: 6, kind: input, shape index: {}]   ;;  %s2506_s3 = inlined_call_operand.vmem [shape: f32[8,8], index: 3, kind: input, shape index: {}]   ;;  %s2507_s9 = inlined_call_operand.vmem [shape: f32[8,128], index: 9, kind: output, shape index: {}]  }
   0x1   :  { %v74_v0 = vld [vmem:[%s2498_s4] sm:$0xff]  ;;  %v75_v2 = vld [vmem:[%s2498_s4 + $0x8] sm:$0xff]  ;;  %248 = vmatprep.mubr.bf16.mxu0 %v2013_v3  ;;  %289 = vmatprep.mubr.bf16.mxu1 %v2013_v3  ;;  %v76_v15 = vld [vmem:[%s2498_s4 + $0x10] sm:$0xff]  ;;  %vm1145_vm3 = vcmask 1043456   ;;  %vm1141_vm4 = vcmask 64512  }
   0x2   :  { %v78_v1 = vld [vmem:[%s2498_s4 + $0x20] sm:$0xff]  ;;  %v79_v6 = vld [vmem:[%s2498_s4 + $0x28] sm:$0xff]  ;;  %v80_v16 = vld [vmem:[%s2498_s4 + $0x30] sm:$0xff] }
   0x3   :  { %v1599_v4 = vcombine.high %v74_v0, %v78_v1  ;;  %v1598_v5 = vcombine.low %v74_v0, %v78_v1  ;;  %v82_v7 = vld [vmem:[%s2498_s4 + $0x40] sm:$0xff]  ;;  %v1601_v9 = vcombine.high %v75_v2, %v79_v6  ;;  %v1600_v10 = vcombine.low %v75_v2, %v79_v6  ;;  %v83_v12 = vld [vmem:[%s2498_s4 + $0x48] sm:$0xff]  ;;  %v77_v19 = vld [vmem:[%s2498_s4 + $0x18] sm:$0xff] }
   0x4   :  { %v86_v8 = vld [vmem:[%s2498_s4 + $0x60] sm:$0xff]  ;;  %v87_v13 = vld [vmem:[%s2498_s4 + $0x68] sm:$0xff]  ;;  %v81_v20 = vld [vmem:[%s2498_s4 + $0x38] sm:$0xff]  ;;  %v1603_v22 = vcombine.high %v76_v15, %v80_v16  ;;  %v1602_v29 = vcombine.low %v76_v15, %v80_v16 }
   0x5   :  { %v1607_v11 = vcombine.high %v82_v7, %v86_v8  ;;  %216 = vmatprep.subr.bf16.mxu0 %v1599_v4  ;;  %v1609_v14 = vcombine.high %v83_v12, %v87_v13  ;;  %257 = vmatprep.subr.bf16.mxu1 %v1601_v9  ;;  %v1606_v17 = vcombine.low %v82_v7, %v86_v8  ;;  %v73_v18 = vld [vmem:[%s2499_s0] sm:$0xff]  ;;  %v84_v23 = vld [vmem:[%s2498_s4 + $0x50] sm:$0xff]  ;;  %v85_v26 = vld [vmem:[%s2498_s4 + $0x58] sm:$0xff] }
   0x6   :  { %217 = vmatpush1.bf16.msra.mxu0 %v1598_v5  ;;  %258 = vmatpush1.bf16.msra.mxu1 %v1600_v10  ;;  %v1608_v21 = vcombine.low %v83_v12, %v87_v13  ;;  %v88_v24 = vld [vmem:[%s2498_s4 + $0x70] sm:$0xff]  ;;  %v1605_v25 = vcombine.high %v77_v19, %v81_v20  ;;  %v90_v27 = vpack.c.bf16 %v73_v18, %v73_v18  ;;  %v89_v28 = vld [vmem:[%s2498_s4 + $0x78] sm:$0xff]  ;;  %v1925_v35 = vld [vmem:[%s2500_s5 + $0x40] sm:$0xff]   ;;  %v92_v5 = vlaneseq }
   0x7   :  { %218 = vmatprep.subr.bf16.mxu0 %v1607_v11  ;;  %259 = vmatprep.subr.bf16.mxu1 %v1609_v14  ;;  %v1611_v30 = vcombine.high %v84_v23, %v88_v24  ;;  %v1604_v31 = vcombine.low %v77_v19, %v81_v20  ;;  %v1613_v32 = vcombine.high %v85_v26, %v89_v28  ;;  %v1927_v36 = vld [vmem:[%s2500_s5 + $0xc0] sm:$0xff]   ;;  %v1929_v39 = vld [vmem:[%s2500_s5 + $0x48] sm:$0xff]   ;;  %v1933_v43 = vld [vmem:[%s2500_s5 + $0x50] sm:$0xff]  }
   0x8   :  { %v1610_v33 = vcombine.low %v84_v23, %v88_v24  ;;  %v1612_v34 = vcombine.low %v85_v26, %v89_v28  ;;  %v1926_v37 = vld [vmem:[%s2500_s5] sm:$0xff]   ;;  %v1931_v40 = vld [vmem:[%s2500_s5 + $0xc8] sm:$0xff]   ;;  %v1935_v44 = vld [vmem:[%s2500_s5 + $0xd0] sm:$0xff]   ;;  %v2223_v6 = vshrl.u32 %v92_v5, 7 }
   0x9   :  { %v1928_v38 = vld [vmem:[%s2500_s5 + $0x80] sm:$0xff]   ;;  %v1930_v41 = vld [vmem:[%s2500_s5 + $0x8] sm:$0xff]   ;;  %v1934_v45 = vld [vmem:[%s2500_s5 + $0x10] sm:$0xff]  }
   0xa   :  { %219 = vmatpush1.bf16.msra.mxu0 %v1606_v17  ;;  %260 = vmatpush1.bf16.msra.mxu1 %v1608_v21  ;;  %v1932_v42 = vld [vmem:[%s2500_s5 + $0x88] sm:$0xff]   ;;  %v1936_v46 = vld [vmem:[%s2500_s5 + $0x90] sm:$0xff]   ;;  %v1937_v47 = vld [vmem:[%s2500_s5 + $0x58] sm:$0xff]   ;;  %v94_v10 = vsub.s32 0, %v2223_v6  ;;  %v98_v11 = vsub.s32 1, %v2223_v6  ;;  %v102_v12 = vsub.s32 2, %v2223_v6 }
   0xb   :  { %298 = vmatprep.subr.bf16.mxu0 %v1603_v22  ;;  %339 = vmatprep.subr.bf16.mxu1 %v1605_v25  ;;  %v1939_v48 = vld [vmem:[%s2500_s5 + $0xd8] sm:$0xff]   ;;  %v1941_v51 = vld [vmem:[%s2500_s5 + $0x60] sm:$0xff]   ;;  %v1945_v55 = vld [vmem:[%s2500_s5 + $0x68] sm:$0xff]   ;;  %v106_v13 = vsub.s32 3, %v2223_v6  ;;  %v114_v26 = vsub.s32 5, %v2223_v6 }
   0xc   :  { %v1938_v49 = vld [vmem:[%s2500_s5 + $0x18] sm:$0xff]   ;;  %v1942_v52 = vld [vmem:[%s2500_s5 + $0x20] sm:$0xff]   ;;  %v1947_v56 = vld [vmem:[%s2500_s5 + $0xe8] sm:$0xff]  }
   0xd   :  { %1614 = vmatmul.mubr.msk.bf16.vlgmr.msra.gmra.mrb[0].mxu0 %vm212_vm0, %v90_v27  ;;  %1615 = vmatmul.mubr.msk.bf16.vlgmr.msra.gmra.mrb[0].mxu1 %vm212_vm0, %v90_v27  ;;  %v1940_v50 = vld [vmem:[%s2500_s5 + $0x98] sm:$0xff]   ;;  %v1943_v53 = vld [vmem:[%s2500_s5 + $0xe0] sm:$0xff]   ;;  %v1946_v57 = vld [vmem:[%s2500_s5 + $0x28] sm:$0xff]  }
   0xe   :  { %299 = vmatpush1.bf16.msra.mxu0 %v1602_v29  ;;  %340 = vmatpush1.bf16.msra.mxu1 %v1604_v31  ;;  %v1944_v54 = vld [vmem:[%s2500_s5 + $0xa0] sm:$0xff]   ;;  %v1948_v58 = vld [vmem:[%s2500_s5 + $0xa8] sm:$0xff]   ;;  %v1949_v59 = vld [vmem:[%s2500_s5 + $0x70] sm:$0xff]   ;;  %v122_v31 = vsub.s32 7, %v2223_v6 }
   0xf   :  { %300 = vmatprep.subr.bf16.mxu0 %v1611_v30  ;;  %330 = vmatprep.mubr.bf16.mxu0 %v2013_v3  ;;  %v1950_v60 = vld [vmem:[%s2500_s5 + $0x30] sm:$0xff]   ;;  %v1953_v63 = vld [vmem:[%s2500_s5 + $0x78] sm:$0xff]   ;;  %v1959_v4 = vld [vmem:[%s2500_s5 + $0x1c0] sm:$0xff]  }
  0x10   :  { %341 = vmatprep.subr.bf16.mxu1 %v1613_v32  ;;  %371 = vmatprep.mubr.bf16.mxu1 %v2013_v3  ;;  %v1951_v61 = vld [vmem:[%s2500_s5 + $0xf0] sm:$0xff]   ;;  %v1954_v0 = vld [vmem:[%s2500_s5 + $0x38] sm:$0xff]   ;;  %v1957_v3 = vld [vmem:[%s2500_s5 + $0x140] sm:$0xff]  }
  0x11   :  { %v1952_v62 = vld [vmem:[%s2500_s5 + $0xb0] sm:$0xff]   ;;  %v1955_v1 = vld [vmem:[%s2500_s5 + $0xf8] sm:$0xff]  }
  0x12   :  { %301 = vmatpush1.bf16.msra.mxu0 %v1610_v33  ;;  %342 = vmatpush1.bf16.msra.mxu1 %v1612_v34  ;;  %v1956_v2 = vld [vmem:[%s2500_s5 + $0xb8] sm:$0xff]  }
  0x13   :  { %1713 = vmatprep.subr.bf16.mxu0 %v1925_v35  ;;  %1735 = vmatprep.subr.bf16.mxu1 %v1927_v36  ;;  %v65_v7 = vld [vmem:[%s2502_s8] ss:$8 sm:$0xf] }
  0x14   :  { %v66_v8 = vld [vmem:[%s2502_s8] ss:$8 sm:$0xf0] }
  0x15   :  { %1616 = vmatmul.mubr.msk.bf16.vlgmr.msra.gmra.mrb[4].mxu0 %vm212_vm0, %v90_v27  ;;  %1617 = vmatmul.mubr.msk.bf16.vlgmr.msra.gmra.mrb[4].mxu1 %vm212_vm0, %v90_v27  ;;  %v2231_v9 = vor.u32 %v66_v8, %v65_v7  ;;  %v1972_v5 = vld [vmem:[%s2500_s5 + $0x198] sm:$0xff]   ;;  %v1973_v7 = vld [vmem:[%s2500_s5 + $0x160] sm:$0xff]  }
  0x16   :  { %1714 = vmatpush3.bf16.msra.mxu0 %v1926_v37  ;;  %1736 = vmatpush3.bf16.msra.mxu1 %v1928_v38  ;;  %v1958_v38 = vld [vmem:[%s2500_s5 + $0x100] sm:$0xff]  }
  0x17   :  { %1715 = vmatprep.subr.bf16.mxu0 %v1929_v39  ;;  %1737 = vmatprep.subr.bf16.mxu1 %v1931_v40  ;;  %v95_v14 = vrot.slane %v2231_v9, %v94_v10  ;;  %v99_v15 = vrot.slane %v2231_v9, %v98_v11  ;;  %v103_v16 = vrot.slane %v2231_v9, %v102_v12  ;;  %v1975_v8 = vld [vmem:[%s2500_s5 + $0x1e0] sm:$0xff]   ;;  %v110_v10 = vsub.s32 4, %v2223_v6 }
  0x18   :  { %v107_v17 = vrot.slane %v2231_v9, %v106_v13  ;;  %v115_v39 = vrot.slane %v2231_v9, %v114_v26  ;;  %v1974_v11 = vld [vmem:[%s2500_s5 + $0x120] sm:$0xff]   ;;  %v118_v12 = vsub.s32 6, %v2223_v6  ;;  %v1978_v6 = vld [vmem:[%s2500_s5 + $0x128] sm:$0xff]  }
  0x19   :  { %v1976_v13 = vld [vmem:[%s2500_s5 + $0x1a0] sm:$0xff]  }
  0x1a   :  { %1716 = vmatpush3.bf16.msra.mxu0 %v1930_v41  ;;  %1738 = vmatpush3.bf16.msra.mxu1 %v1932_v42  ;;  %v1960_v42 = vld [vmem:[%s2500_s5 + $0x180] sm:$0xff]  }
  0x1b   :  { %1717 = vmatprep.subr.bf16.mxu0 %v1933_v43  ;;  %1739 = vmatprep.subr.bf16.mxu1 %v1935_v44  ;;  %v1961_v43 = vld [vmem:[%s2500_s5 + $0x148] sm:$0xff]   ;;  %v123_v44 = vrot.slane %v2231_v9, %v122_v31 }
  0x1e   :  { %1718 = vmatpush3.bf16.msra.mxu0 %v1934_v45  ;;  %1740 = vmatpush3.bf16.msra.mxu1 %v1936_v46  ;;  %v1963_v45 = vld [vmem:[%s2500_s5 + $0x1c8] sm:$0xff]  }
  0x1f   :  { %1719 = vmatprep.subr.bf16.mxu0 %v1937_v47  ;;  %1741 = vmatprep.subr.bf16.mxu1 %v1939_v48 }
  0x22   :  { %1720 = vmatpush3.bf16.msra.mxu0 %v1938_v49  ;;  %1742 = vmatpush3.bf16.msra.mxu1 %v1940_v50  ;;  %v1962_v49 = vld [vmem:[%s2500_s5 + $0x108] sm:$0xff]  }
  0x23   :  { %1721 = vmatprep.subr.bf16.mxu0 %v1941_v51  ;;  %1743 = vmatprep.subr.bf16.mxu1 %v1943_v53  ;;  %v1964_v53 = vld [vmem:[%s2500_s5 + $0x188] sm:$0xff]  }
  0x26   :  { %1722 = vmatpush3.bf16.msra.mxu0 %v1942_v52  ;;  %1744 = vmatpush3.bf16.msra.mxu1 %v1944_v54  ;;  %v1965_v54 = vld [vmem:[%s2500_s5 + $0x150] sm:$0xff]  }
  0x27   :  { %1723 = vmatprep.subr.bf16.mxu0 %v1945_v55  ;;  %1745 = vmatprep.subr.bf16.mxu1 %v1947_v56 }
  0x2a   :  { %1724 = vmatpush3.bf16.msra.mxu0 %v1946_v57  ;;  %1746 = vmatpush3.bf16.msra.mxu1 %v1948_v58  ;;  %v1967_v58 = vld [vmem:[%s2500_s5 + $0x1d0] sm:$0xff]  }
  0x2b   :  { %1725 = vmatprep.subr.bf16.mxu0 %v1949_v59  ;;  %1747 = vmatprep.subr.bf16.mxu1 %v1951_v61 }
  0x2e   :  { %1726 = vmatpush3.bf16.msra.mxu0 %v1950_v60  ;;  %1748 = vmatpush3.bf16.msra.mxu1 %v1952_v62  ;;  %v1966_v62 = vld [vmem:[%s2500_s5 + $0x110] sm:$0xff]  }
  0x2f   :  { %1727 = vmatprep.subr.bf16.mxu0 %v1953_v63  ;;  %1749 = vmatprep.subr.bf16.mxu1 %v1955_v1  ;;  %v1969_v1 = vld [vmem:[%s2500_s5 + $0x158] sm:$0xff]  }
  0x32   :  { %1728 = vmatpush3.bf16.msra.mxu0 %v1954_v0  ;;  %1750 = vmatpush3.bf16.msra.mxu1 %v1956_v2  ;;  %v1968_v0 = vld [vmem:[%s2500_s5 + $0x190] sm:$0xff]  }
  0x33   :  { %1757 = vmatprep.subr.bf16.mxu0 %v1957_v3  ;;  %1779 = vmatprep.subr.bf16.mxu1 %v1959_v4  ;;  %v1971_v3 = vld [vmem:[%s2500_s5 + $0x1d8] sm:$0xff]  }
  0x34   :  { %v1970_v4 = vld [vmem:[%s2500_s5 + $0x118] sm:$0xff]  }
  0xe0   :  { %v250_v18 = vpop.f32.mrb[0].mxu0  ;;  %v291_v21 = vpop.f32.mrb[0].mxu1 }
  0xe1   :  { %v251_v19 = vadd.f32 %v250_v18, %v95_v14  ;;  %v252_v20 = vpop.f32.mrb[1].mxu0  ;;  %v292_v24 = vadd.f32 %v291_v21, %v103_v16  ;;  %v293_v25 = vpop.f32.mrb[1].mxu1  ;;  %v1977_v14 = vld [vmem:[%s2500_s5 + $0x168] sm:$0xff]   ;;  %v111_v16 = vrot.slane %v2231_v9, %v110_v10  ;;  %v1993_v10 = vld [vmem:[%s2501_s7] ss:$16 sps:$4 sm:$0xff]  }
  0xe2   :  { %v253_v22 = vadd.f32 %v252_v20, %v99_v15  ;;  %v254_v23 = vpop.f32.mrb[2].mxu0  ;;  %v294_v29 = vadd.f32 %v293_v25, %v107_v17  ;;  %v295_v30 = vpop.f32.mrb[2].mxu1  ;;  %v1979_v15 = vld [vmem:[%s2500_s5 + $0x1e8] sm:$0xff]   ;;  %v119_v17 = vrot.slane %v2231_v9, %v118_v12  ;;  %v1983_v20 = vld [vmem:[%s2500_s5 + $0x1f0] sm:$0xff]   ;;  %v1987_v25 = vld [vmem:[%s2500_s5 + $0x1f8] sm:$0xff]  }
  0xe3   :  { %v380_v27 = vmax.f32 %v251_v19, 0.0  ;;  %v255_v28 = vpop.f32.mrb[3].mxu0  ;;  %v382_v33 = vmax.f32 %v292_v24, 0.0  ;;  %v296_v34 = vpop.f32.mrb[3].mxu1  ;;  %v1980_v18 = vld [vmem:[%s2500_s5 + $0x1a8] sm:$0xff]   ;;  %v1981_v19 = vld [vmem:[%s2500_s5 + $0x170] sm:$0xff]  }
  0xe4   :  { %v381_v32 = vmax.f32 %v253_v22, 0.0  ;;  %v383_v35 = vmax.f32 %v294_v29, 0.0  ;;  %v1982_v9 = vld [vmem:[%s2500_s5 + $0x130] sm:$0xff]   ;;  %v1985_v24 = vld [vmem:[%s2500_s5 + $0x178] sm:$0xff]  }
  0xe5   :  { %v518_v37 = vpack.c.bf16 %v382_v33, %v382_v33  ;;  %v516_v40 = vpack.c.bf16 %v380_v27, %v380_v27  ;;  %v1984_v23 = vld [vmem:[%s2500_s5 + $0x1b0] sm:$0xff]   ;;  %v1986_v28 = vld [vmem:[%s2500_s5 + $0x138] sm:$0xff]   ;;  %v2014_v33 = vmov 0.0  }
  0xe6   :  { %v517_v36 = vpack.c.bf16 %v381_v32, %v381_v32  ;;  %v519_v41 = vpack.c.bf16 %v383_v35, %v383_v35  ;;  %v1988_v29 = vld [vmem:[%s2500_s5 + $0x1b8] sm:$0xff]   ;;  %v1995_v12 = vld [vmem:[%s2501_s7 + $0x40] ss:$16 sps:$4 sm:$0xff]  }
  0xe7   :  { %v1989_v32 = vld [vmem:[%s2501_s7 + $0xc] ss:$16 sps:$4 sm:$0xff]  }
  0xe8   :  { %940 = vmatprep.mubr.bf16.mxu0 %v517_v36  ;;  %v2257_v46 = vpop.f32.mrb[4].mxu0  ;;  %980 = vmatprep.mubr.bf16.mxu1 %v519_v41  ;;  %v373_v48 = vpop.f32.mrb[4].mxu1  ;;  %v1990_v34 = vld [vmem:[%s2501_s7 + $0x2c] ss:$16 sps:$4 sm:$0xff]  }
  0xe9   :  { %941 = vmatmul.mubr.bf16.vlgmr.msra.gmra.mrb[8].mxu0 %v516_v40  ;;  %v334_v47 = vpop.f32.mrb[5].mxu0  ;;  %981 = vmatmul.mubr.bf16.vlgmr.msra.gmra.mrb[8].mxu1 %v518_v37  ;;  %v375_v52 = vpop.f32.mrb[5].mxu1  ;;  %v333_v21 = vadd.f32 %v2257_v46, %v111_v16  ;;  %v374_v22 = vadd.f32 %v373_v48, %v119_v17  ;;  %v1991_v35 = vld [vmem:[%s2501_s7 + $0x4c] ss:$16 sps:$4 sm:$0xff]   ;;  %v1070_v37 = vld [vmem:[%s2503_s1] sm:$0xff] }
  0xea   :  { %1758 = vmatpush3.bf16.msra.mxu0 %v1958_v38  ;;  %v335_v50 = vadd.f32 %v334_v47, %v115_v39  ;;  %v336_v51 = vpop.f32.mrb[6].mxu0  ;;  %1780 = vmatpush3.bf16.msra.mxu1 %v1960_v42  ;;  %v376_v56 = vadd.f32 %v375_v52, %v123_v44  ;;  %v377_v57 = vpop.f32.mrb[6].mxu1  ;;  %v1992_v36 = vld [vmem:[%s2501_s7 + $0x6c] ss:$16 sps:$4 sm:$0xff]   ;;  %v1071_v38 = vpack.c.bf16 %v1070_v37, %v1070_v37  ;;  %v68_v40 = vld [vmem:[%s2502_s8 + $0x1] ss:$0 sm:$0xff] }
  0xeb   :  { %1759 = vmatprep.subr.bf16.mxu0 %v1961_v43  ;;  %v337_v55 = vpop.f32.mrb[7].mxu0  ;;  %1781 = vmatprep.subr.bf16.mxu1 %v1963_v45  ;;  %v378_v60 = vpop.f32.mrb[7].mxu1  ;;  %v384_v26 = vmax.f32 %v333_v21, 0.0  ;;  %v386_v27 = vmax.f32 %v374_v22, 0.0 }
  0xec   :  { %v385_v59 = vmax.f32 %v335_v50, 0.0  ;;  %v387_v61 = vmax.f32 %v376_v56, 0.0 }
  0xed   :  { %v520_v30 = vpack.c.bf16 %v384_v26, %v384_v26  ;;  %v522_v31 = vpack.c.bf16 %v386_v27, %v386_v27  ;;  %v2001_v26 = vld [vmem:[%s2505_s6] sm:$0xff]   ;;  %v2002_v27 = vld [vmem:[%s2505_s6 + $0x8] sm:$0xff]  }
  0xee   :  { %1760 = vmatpush3.bf16.msra.mxu0 %v1962_v49  ;;  %v521_v63 = vpack.c.bf16 %v385_v59, %v385_v59  ;;  %1782 = vmatpush3.bf16.msra.mxu1 %v1964_v53  ;;  %v523_v2 = vpack.c.bf16 %v387_v61, %v387_v61 }
  0xef   :  { %1761 = vmatprep.subr.bf16.mxu0 %v1965_v54  ;;  %1783 = vmatprep.subr.bf16.mxu1 %v1967_v58 }
  0xf0   :  { %1020 = vmatprep.mubr.bf16.mxu0 %v521_v63  ;;  %1060 = vmatprep.mubr.bf16.mxu1 %v523_v2 }
  0xf2   :  { %1762 = vmatpush3.bf16.msra.mxu0 %v1966_v62  ;;  %1784 = vmatpush3.bf16.msra.mxu1 %v1968_v0 }
  0xf3   :  { %1763 = vmatprep.subr.bf16.mxu0 %v1969_v1  ;;  %1785 = vmatprep.subr.bf16.mxu1 %v1971_v3  ;;  %v1068_v1 = vld [vmem:[%s2504_s2] sm:$0xff] }
  0xf6   :  { %1764 = vmatpush3.bf16.msra.mxu0 %v1970_v4  ;;  %1786 = vmatpush3.bf16.msra.mxu1 %v1972_v5 }
  0xf7   :  { %1765 = vmatprep.subr.bf16.mxu0 %v1973_v7  ;;  %1787 = vmatprep.subr.bf16.mxu1 %v1975_v8  ;;  %v1069_v8 = vpack.c.bf16 %v1068_v1, %v1068_v1 }
  0xfa   :  { %1766 = vmatpush3.bf16.msra.mxu0 %v1974_v11  ;;  %1788 = vmatpush3.bf16.msra.mxu1 %v1976_v13  ;;  %v1994_v11 = vld [vmem:[%s2501_s7 + $0x20] ss:$16 sps:$4 sm:$0xff]  }
  0xfb   :  { %1767 = vmatprep.subr.bf16.mxu0 %v1977_v14  ;;  %1789 = vmatprep.subr.bf16.mxu1 %v1979_v15  ;;  %v1996_v13 = vld [vmem:[%s2501_s7 + $0x60] ss:$16 sps:$4 sm:$0xff]  }
  0xfc   :  { %v69_v14 = vld [vmem:[%s2502_s8 + $0x2] ss:$0 sm:$0xff] }
  0xfe   :  { %1768 = vmatpush3.bf16.msra.mxu0 %v1978_v6  ;;  %1790 = vmatpush3.bf16.msra.mxu1 %v1980_v18 }
  0xff   :  { %1769 = vmatprep.subr.bf16.mxu0 %v1981_v19  ;;  %1791 = vmatprep.subr.bf16.mxu1 %v1983_v20 }
 0x102   :  { %1770 = vmatpush3.bf16.msra.mxu0 %v1982_v9  ;;  %1792 = vmatpush3.bf16.msra.mxu1 %v1984_v23 }
 0x103   :  { %1771 = vmatprep.subr.bf16.mxu0 %v1985_v24  ;;  %1793 = vmatprep.subr.bf16.mxu1 %v1987_v25 }
 0x106   :  { %1772 = vmatpush3.bf16.msra.mxu0 %v1986_v28  ;;  %1794 = vmatpush3.bf16.msra.mxu1 %v1988_v29  ;;  %v2003_v28 = vld [vmem:[%s2505_s6 + $0x10] sm:$0xff]   ;;  %v2004_v29 = vld [vmem:[%s2505_s6 + $0x18] sm:$0xff]  }
 0x107   :  { %1836 = vmatprep.subr.bf16.mxu0 %v2014_v33  ;;  %1848 = vmatprep.subr.bf16.mxu1 %v2014_v33 }
 0x109   :  { %1021 = vmatmul.mubr.bf16.vlgmr.msra.gmra.mrb[12].mxu0 %v520_v30  ;;  %1061 = vmatmul.mubr.bf16.vlgmr.msra.gmra.mrb[12].mxu1 %v522_v31  ;;  %v2005_v30 = vld [vmem:[%s2505_s6 + $0x20] sm:$0xff]   ;;  %v2006_v31 = vld [vmem:[%s2505_s6 + $0x28] sm:$0xff]  }
 0x10a   :  { %1837 = vmatpush3.bf16.msra.mxu0 %v1989_v32  ;;  %1844 = vmatprep.mubr.msk.bf16.mxu0 %vm2015_vm1, %v2014_v33  ;;  %v2007_v32 = vld [vmem:[%s2505_s6 + $0x30] sm:$0xff]  }
 0x10b   :  { %1838 = vmatprep.subr.bf16.mxu0 %v2014_v33  ;;  %1850 = vmatprep.mubr.msk.bf16.mxu1 %vm2015_vm1, %v2014_v33 }
 0x10e   :  { %1839 = vmatpush3.bf16.msra.mxu0 %v1990_v34  ;;  %v70_v34 = vld [vmem:[%s2502_s8 + $0x3] ss:$0 sm:$0xff] }
 0x10f   :  { %1840 = vmatprep.subr.bf16.mxu0 %v2014_v33 }
 0x112   :  { %1841 = vmatpush3.bf16.msra.mxu0 %v1991_v35 }
 0x113   :  { %1842 = vmatprep.subr.bf16.mxu0 %v2014_v33 }
 0x116   :  { %1843 = vmatpush3.bf16.msra.mxu0 %v1992_v36 }
 0x117   :  { %1866 = vmatprep.subr.bf16.mxu0 %v2014_v33 }
 0x119   :  { %1845 = vmatmul.mubr.msk.bf16.vlgmr.msra.gmra.mrb[16].mxu0 %vm1096_vm2, %v1071_v38 }
 0x11a   :  { %1868 = vmatprep.mubr.msk.bf16.mxu0 %vm2015_vm1, %v2014_v33 }
 0x1bc   :  { %v1729_v39 = vpop.f32.mrb[8].mxu0  ;;  %v1751_v42 = vpop.f32.mrb[8].mxu1 }
 0x1bd   :  { %v1730_v41 = vpop.f32.mrb[9].mxu0  ;;  %v1752_v45 = vpop.f32.mrb[9].mxu1 }
 0x1be   :  { %v1731_v43 = vadd.f32 %v1730_v41, %v1729_v39  ;;  %v1732_v44 = vpop.f32.mrb[10].mxu0  ;;  %v1753_v47 = vadd.f32 %v1752_v45, %v1751_v42  ;;  %v1754_v48 = vpop.f32.mrb[10].mxu1  ;;  %v1302_v39 = vld [vmem:[%s2506_s3] sm:$0xff]  ;;  %v1998_v45 = vld [vmem:[%s2501_s7 + $0x28] ss:$16 sps:$4 sm:$0xff]  }
 0x1bf   :  { %v1733_v46 = vpop.f32.mrb[11].mxu0  ;;  %v1755_v50 = vpop.f32.mrb[11].mxu1  ;;  %v1997_v44 = vld [vmem:[%s2501_s7 + $0x8] ss:$16 sps:$4 sm:$0xff]  }
 0x1c0   :  { %v943_v49 = vadd.f32 %v1731_v43, %v68_v40  ;;  %v1303_v43 = vpack.c.bf16 %v1302_v39, %v1302_v39  ;;  %v1999_v46 = vld [vmem:[%s2501_s7 + $0x48] ss:$16 sps:$4 sm:$0xff]   ;;  %v2009_v50 = vld [vmem:[%s2501_s7 + $0x4] ss:$16 sps:$4 sm:$0xff]  }
 0x1c2   :  { %v983_v51 = vadd.f32 %v1753_v47, %v943_v49  ;;  %v2000_v47 = vld [vmem:[%s2501_s7 + $0x68] ss:$16 sps:$4 sm:$0xff]  }
 0x1c3   :  { %v2008_v49 = vld [vmem:[%s2505_s6 + $0x38] sm:$0xff]  }
 0x1dc   :  { %v1773_v52 = vpop.f32.mrb[12].mxu0  ;;  %v1795_v54 = vpop.f32.mrb[12].mxu1 }
 0x1dd   :  { %v1774_v53 = vpop.f32.mrb[13].mxu0  ;;  %v1796_v57 = vpop.f32.mrb[13].mxu1 }
 0x1de   :  { %v1775_v55 = vadd.f32 %v1774_v53, %v1773_v52  ;;  %v1776_v56 = vpop.f32.mrb[14].mxu0  ;;  %v1797_v59 = vadd.f32 %v1796_v57, %v1795_v54  ;;  %v1798_v60 = vpop.f32.mrb[14].mxu1  ;;  %v2011_v52 = vld [vmem:[%s2501_s7 + $0x44] ss:$16 sps:$4 sm:$0xff]  }
 0x1df   :  { %v1777_v58 = vpop.f32.mrb[15].mxu0  ;;  %v1799_v62 = vpop.f32.mrb[15].mxu1 }
 0x1e0   :  { %v1023_v61 = vadd.f32 %v1775_v55, %v983_v51  ;;  %v2010_v51 = vld [vmem:[%s2501_s7 + $0x24] ss:$16 sps:$4 sm:$0xff]  }
 0x1e1   :  { %v2012_v62 = vld [vmem:[%s2501_s7 + $0x64] ss:$16 sps:$4 sm:$0xff]  }
 0x1e2   :  { %v2373_v63 = vadd.f32 %v1797_v59, %v1023_v61 }
 0x1e4   :  { %v1457_v48 = vpack.c.bf16 %v2373_v63, %v2373_v63  ;;  %v71_v63 = vld [vmem:[%s2502_s8 + $0x4] ss:$0 sm:$0xff] }
 0x1ec   :  { %v1134_v0 = vpop.f32.mrb[16].mxu0 }
 0x1ed   :  { %v1140_v2 = vpack.c.bf16 %v1134_v0, %v1134_v0  ;;  %v1846_v3 = vpop.f32.mrb[17].mxu0 }
 0x1ee   :  { %v1137_v4 = vpop.f32.mrb[18].mxu0 }
 0x1ef   :  { %v1147_v5 = vsel %vm1145_vm3, %v1140_v2, 0  ;;  %v1847_v7 = vpop.f32.mrb[19].mxu0 }
 0x1f0   :  { %1849 = vmatpush3.bf16.msra.mxu1 %v1147_v5  ;;  %v72_v5 = vld [vmem:[%s2502_s8 + $0x5] ss:$0 sm:$0xff] }
 0x1f1   :  { %1854 = vmatprep.subr.bf16.mxu1 %v2014_v33 }
 0x1f3   :  { %1851 = vmatmul.mubr.msk.bf16.vlgmr.msra.gmra.mrb[16].mxu1 %vm1141_vm4, %v1069_v8 }
 0x1f4   :  { %1855 = vmatpush3.bf16.msra.mxu1 %v1993_v10  ;;  %1862 = vmatprep.mubr.msk.bf16.mxu1 %vm2015_vm1, %v2014_v33 }
 0x1f5   :  { %1856 = vmatprep.subr.bf16.mxu1 %v2014_v33 }
 0x1f8   :  { %1857 = vmatpush3.bf16.msra.mxu1 %v1994_v11 }
 0x1f9   :  { %1858 = vmatprep.subr.bf16.mxu1 %v2014_v33 }
 0x1fc   :  { %1859 = vmatpush3.bf16.msra.mxu1 %v1995_v12 }
 0x1fd   :  { %1860 = vmatprep.subr.bf16.mxu1 %v2014_v33 }
 0x200   :  { %1861 = vmatpush3.bf16.msra.mxu1 %v1996_v13 }
 0x201   :  { %1878 = vmatprep.subr.bf16.mxu1 %v2014_v33 }
 0x2c6   :  { %v1183_v15 = vpop.f32.mrb[16].mxu1 }
 0x2c7   :  { %v1184_v16 = vadd.f32 %v1183_v15, %v69_v14  ;;  %v1852_v6 = vpop.f32.mrb[17].mxu1 }
 0x2c8   :  { %v1186_v17 = vpop.f32.mrb[18].mxu1 }
 0x2c9   :  { %v1189_v18 = vmax.f32 %v1184_v16, 0.0  ;;  %v1853_v19 = vpop.f32.mrb[19].mxu1 }
 0x2cb   :  { %v1190_v20 = vpack.c.bf16 %v1189_v18, %v1189_v18 }
 0x2cd   :  { %1863 = vmatmul.mubr.msk.bf16.vlgmr.msra.gmra.mrb[20].mxu1 %vm1096_vm2, %v1190_v20 }
 0x2ce   :  { %1894 = vmatprep.mubr.msk.bf16.mxu1 %vm2015_vm1, %v2014_v33  ;;  %1879 = vmatpush3.bf16.msra.mxu1 %v2001_v26 }
 0x2cf   :  { %1880 = vmatprep.subr.bf16.mxu1 %v2014_v33 }
 0x2d2   :  { %1881 = vmatpush3.bf16.msra.mxu1 %v2002_v27 }
 0x2d3   :  { %1882 = vmatprep.subr.bf16.mxu1 %v2014_v33 }
 0x2d6   :  { %1883 = vmatpush3.bf16.msra.mxu1 %v2003_v28 }
 0x2d7   :  { %1884 = vmatprep.subr.bf16.mxu1 %v2014_v33 }
 0x2da   :  { %1885 = vmatpush3.bf16.msra.mxu1 %v2004_v29 }
 0x2db   :  { %1886 = vmatprep.subr.bf16.mxu1 %v2014_v33 }
 0x2de   :  { %1887 = vmatpush3.bf16.msra.mxu1 %v2005_v30 }
 0x2df   :  { %1888 = vmatprep.subr.bf16.mxu1 %v2014_v33 }
 0x2e2   :  { %1889 = vmatpush3.bf16.msra.mxu1 %v2006_v31 }
 0x2e3   :  { %1890 = vmatprep.subr.bf16.mxu1 %v2014_v33 }
 0x2e6   :  { %1891 = vmatpush3.bf16.msra.mxu1 %v2007_v32 }
 0x2e7   :  { %1892 = vmatprep.subr.bf16.mxu1 %v2014_v33 }
 0x2ea   :  { %1893 = vmatpush3.bf16.msra.mxu1 %v2008_v49 }
 0x3a0   :  { %v1252_v21 = vpop.f32.mrb[20].mxu1 }
 0x3a1   :  { %v1258_v22 = vpack.c.bf16 %v1252_v21, %v1252_v21  ;;  %v1864_v9 = vpop.f32.mrb[21].mxu1 }
 0x3a2   :  { %v1255_v23 = vpop.f32.mrb[22].mxu1 }
 0x3a3   :  { %v1260_v24 = vsel %vm1145_vm3, %v1258_v22, 0  ;;  %v1865_v25 = vpop.f32.mrb[23].mxu1 }
 0x3a4   :  { %1867 = vmatpush3.bf16.msra.mxu0 %v1260_v24 }
 0x3a5   :  { %1872 = vmatprep.subr.bf16.mxu0 %v2014_v33 }
 0x3a7   :  { %1869 = vmatmul.mubr.msk.bf16.vlgmr.msra.gmra.mrb[20].mxu0 %vm1141_vm4, %v1069_v8 }
 0x3a8   :  { %1874 = vmatprep.mubr.msk.bf16.mxu0 %vm2015_vm1, %v2014_v33 }
 0x47a   :  { %v1296_v35 = vpop.f32.mrb[20].mxu0 }
 0x47b   :  { %v1297_v36 = vadd.f32 %v1296_v35, %v70_v34  ;;  %v1870_v37 = vpop.f32.mrb[21].mxu0 }
 0x47c   :  { %v1299_v38 = vpop.f32.mrb[22].mxu0 }
 0x47d   :  { %v1304_v40 = vpack.c.bf16 %v1297_v36, %v1297_v36  ;;  %v1871_v41 = vpop.f32.mrb[23].mxu0 }
 0x47f   :  { %v1309_v42 = vsel %vm1145_vm3, %v1304_v40, 0 }
 0x480   :  { %1873 = vmatpush3.bf16.msra.mxu0 %v1309_v42 }
 0x481   :  { %1898 = vmatprep.subr.bf16.mxu0 %v2014_v33 }
 0x483   :  { %1875 = vmatmul.mubr.msk.bf16.vlgmr.msra.gmra.mrb[24].mxu0 %vm1141_vm4, %v1303_v43 }
 0x484   :  { %1899 = vmatpush3.bf16.msra.mxu0 %v1997_v44  ;;  %1906 = vmatprep.mubr.msk.bf16.mxu0 %vm2015_vm1, %v2014_v33 }
 0x485   :  { %1900 = vmatprep.subr.bf16.mxu0 %v2014_v33 }
 0x488   :  { %1901 = vmatpush3.bf16.msra.mxu0 %v1998_v45 }
 0x489   :  { %1902 = vmatprep.subr.bf16.mxu0 %v2014_v33 }
 0x48c   :  { %1903 = vmatpush3.bf16.msra.mxu0 %v1999_v46 }
 0x48d   :  { %1904 = vmatprep.subr.bf16.mxu0 %v2014_v33 }
 0x490   :  { %1905 = vmatpush3.bf16.msra.mxu0 %v2000_v47 }
 0x491   :  { %1910 = vmatprep.subr.bf16.mxu0 %v2014_v33 }
 0x493   :  { %1907 = vmatmul.mubr.msk.bf16.vlgmr.msra.gmra.mrb[28].mxu0 %vm1096_vm2, %v1457_v48 }
 0x494   :  { %1918 = vmatprep.mubr.msk.bf16.mxu0 %vm2015_vm1, %v2014_v33  ;;  %1911 = vmatpush3.bf16.msra.mxu0 %v2009_v50 }
 0x495   :  { %1912 = vmatprep.subr.bf16.mxu0 %v2014_v33 }
 0x498   :  { %1913 = vmatpush3.bf16.msra.mxu0 %v2010_v51 }
 0x499   :  { %1914 = vmatprep.subr.bf16.mxu0 %v2014_v33 }
 0x49c   :  { %1915 = vmatpush3.bf16.msra.mxu0 %v2011_v52 }
 0x49d   :  { %1916 = vmatprep.subr.bf16.mxu0 %v2014_v33 }
 0x4a0   :  { %1917 = vmatpush3.bf16.msra.mxu0 %v2012_v62 }
 0x556   :  { %v1345_v53 = vpop.f32.mrb[24].mxu0 }
 0x557   :  { %v1367_v54 = vpack.c.bf16 %v1345_v53, %v1345_v53  ;;  %v1876_v55 = vpop.f32.mrb[25].mxu0 }
 0x558   :  { %v1348_v56 = vpop.f32.mrb[26].mxu0 }
 0x559   :  { %1895 = vmatmul.mubr.bf16.vlgmr.msra.gmra.mrb[24].mxu1 %v1367_v54  ;;  %v1877_v57 = vpop.f32.mrb[27].mxu0 }
 0x566   :  { %v1519_v58 = vpop.f32.mrb[28].mxu0 }
 0x567   :  { %v1908_v59 = vpop.f32.mrb[29].mxu0 }
 0x568   :  { %v1522_v60 = vpop.f32.mrb[30].mxu0 }
 0x569   :  { %v1909_v61 = vpop.f32.mrb[31].mxu0 }
 0x62c   :  { %v1450_v33 = vpop.f32.mrb[24].mxu1 }
 0x62d   :  { %v1451_v0 = vadd.f32 %v1450_v33, %v71_v63  ;;  %v1896_v1 = vpop.f32.mrb[25].mxu1 }
 0x62e   :  { %v1453_v2 = vpop.f32.mrb[26].mxu1 }
 0x62f   :  { %v1456_v3 = vpack.c.bf16 %v1451_v0, %v1451_v0  ;;  %v1897_v4 = vpop.f32.mrb[27].mxu1 }
 0x631   :  { %1919 = vmatmul.mubr.msk.bf16.vlgmr.msra.gmra.mrb[32].mxu0 %vm1096_vm2, %v1456_v3 }
 0x704   :  { %v1586_v7 = vpop.f32.mrb[32].mxu0 }
 0x705   :  { %v1587_v8 = vadd.f32 %v1586_v7, %v1519_v58  ;;  %v1920_v10 = vpop.f32.mrb[33].mxu0 }
 0x706   :  { %v1589_v11 = vpop.f32.mrb[34].mxu0 }
 0x707   :  { %v1592_v12 = vadd.f32 %v1587_v8, %v72_v5  ;;  %v1921_v13 = vpop.f32.mrb[35].mxu0 }
 0x709   :  { %1593 = vst [vmem:[%s2507_s9] sm:$0xff] %v1592_v12 }

</bundles_post_ra>
